<compile_context>
chip_gen: v6e
topology: v6e:2x2x1
jax: 0.10.0
libtpu: 0.0.40
codegen_flags: <defaults>
</compile_context>

<pallas_src>
import functools

import jax
import jax.numpy as jnp
from jax import lax
from jax.experimental import pallas as pl
from jax.experimental.pallas import tpu as pltpu

# ----- module hyper-parameters (consistent with __init__) -----
IN_DIM = 32        # in_dim
OUT_DIM = 16       # out_dim  (D)
NUM_HEADS = 2      # num_heads (H)
CLAMP = 5.0        # clamp
USE_BIAS = True    # use_bias
# dropout = 0.0 (identity), act = None (identity), edge_enhance = True

N_NODES = 8
N_EDGES = 16


# --------------------------- fused forward kernel ---------------------------
def _grit_fused_kernel(ei_ref, eit_ref, x_ref, ea_ref,
                       wkvq_ref, bkvq_ref, we_ref, be_ref,
                       aw_ref, ver_ref,
                       wv_ref, e_out_ref,
                       *, num_heads, out_dim, n_nodes, clamp):
    H, D = num_heads, out_dim
    HD = H * D
    ne = ea_ref.shape[0]
    f32 = jnp.float32

    # ---- fused node projections: one (N, IN) @ (IN, 3*HD) MXU pass ----
    # column order is [K | V | Q] so the src-gather of K,V is one contiguous slice.
    kvq = jnp.dot(x_ref[...], wkvq_ref[...], preferred_element_type=f32) + bkvq_ref[...]

    # ---- edge projection (weights pre-permuted so output is [E_w | E_b]) ----
    e_full = jnp.dot(ea_ref[...], we_ref[...], preferred_element_type=f32) + be_ref[...]
    e_w = e_full[:, :HD]
    e_b = e_full[:, HD:]

    # ---- build one-hot masks from edge_index in-kernel (VPU compares) ----
    # gather masks, shape (Ne, N): row e is one_hot(src[e]) / one_hot(dst[e])
    gi = lax.broadcasted_iota(jnp.int32, (ne, n_nodes), 1)
    src_g = (gi == eit_ref[:, 0:1]).astype(f32)
    dst_g = (gi == eit_ref[:, 1:2]).astype(f32)
    # scatter mask, shape (N, Ne): column e is one_hot(dst[e])
    si = lax.broadcasted_iota(jnp.int32, (n_nodes, ne), 0)
    dst_s = (si == ei_ref[1:2, :]).astype(f32)

    # ---- gather K[src], V[src] (one matmul) and Q[dst] ----
    kv_src = jnp.dot(src_g, kvq[:, :2 * HD], preferred_element_type=f32)   # (Ne, 2HD)
    q_dst = jnp.dot(dst_g, kvq[:, 2 * HD:], preferred_element_type=f32)    # (Ne, HD)
    k_src = kv_src[:, :HD]
    v_src = kv_src[:, HD:]

    # ---- score = signed-sqrt((K_src + Q_dst) * E_w) + E_b ; act = Identity ----
    score = (k_src + q_dst) * e_w
    sqrt_eps = jnp.float32(1e-8) ** 0.5
    mag = jnp.sqrt(jnp.abs(score) + 1e-8) - sqrt_eps
    score = jnp.where(score >= 0, mag, -mag)
    e_t = score + e_b                                   # (Ne, HD)
    e_out_ref[...] = e_t                                # batch.wE = score.flatten(1)

    # ---- per-edge per-head logits: e_t @ blockdiag(Aw), replicated over D lanes ----
    s = jnp.dot(e_t, aw_ref[...], preferred_element_type=f32)              # (Ne, HD)
    s = jnp.clip(s, -clamp, clamp)
    # TODO(synk): node_logprob / node_prob / attack_mode batch branches not modeled.

    # ---- segment softmax over destination node, all heads at once ----
    # Subtracting one global per-column max is mathematically identical to the
    # per-segment max (softmax is shift-invariant per segment) and numerically
    # safe because |s| <= clamp.
    exp_s = jnp.exp(s - jnp.max(s, axis=0, keepdims=True))                 # (Ne, HD)

    # un-normalised scatters to destination nodes
    node_sum = jnp.dot(dst_s, exp_s, preferred_element_type=f32)           # (N, HD)
    wv_raw = jnp.dot(dst_s, v_src * exp_s, preferred_element_type=f32)     # (N, HD)
    row_raw = jnp.dot(dst_s, e_t * exp_s, preferred_element_type=f32)      # (N, HD)
    # TODO(synk): attention dropout is identity (p = 0 / eval mode).

    # node-level normalisation (equivalent to per-edge attn = exp_s / denom[dst])
    inv = pl.reciprocal(node_sum + 1e-16, approx=True)                     # (N, HD)
    wv = wv_raw * inv
    wv = wv + jnp.dot(row_raw * inv, ver_ref[...], preferred_element_type=f32)
    wv_ref[...] = wv


def grit_attention_fused(edge_index, edge_index_t, x, edge_attr,
                         w_kvq, b_kvq, w_e, b_e, aw_bd, ver_bd,
                         *, num_heads, out_dim, clamp):
    n, in_dim = x.shape
    ne = edge_attr.shape[0]
    hd = num_heads * out_dim
    kernel = functools.partial(_grit_fused_kernel, num_heads=num_heads,
                               out_dim=out_dim, n_nodes=n, clamp=clamp)

    def full(shape):
        return pl.BlockSpec(shape, lambda i: (0,) * len(shape))

    wv, e_out = pl.pallas_call(
        kernel,
        out_shape=(jax.ShapeDtypeStruct((n, hd), jnp.float32),
                   jax.ShapeDtypeStruct((ne, hd), jnp.float32)),
        grid=(1,),
        in_specs=[
            full((2, ne)),             # edge_index (int32), row layout
            full((ne, 2)),             # edge_index transposed (int32)
            full((n, in_dim)),         # x
            full((ne, in_dim)),        # edge_attr
            full((in_dim, 3 * hd)),    # [Wk | Wv | Wq]
            full((1, 3 * hd)),         # [bk | bv | bq]
            full((in_dim, 2 * hd)),    # We (columns permuted to [E_w | E_b])
            full((1, 2 * hd)),         # be (permuted)
            full((hd, hd)),            # blockdiag(Aw), replicated per head block
            full((hd, hd)),            # blockdiag(VeRow)
        ],
        out_specs=(full((n, hd)), full((ne, hd))),
        compiler_params=pltpu.CompilerParams(dimension_semantics=("arbitrary",)),
    )(edge_index, edge_index_t, x, edge_attr, w_kvq, b_kvq, w_e, b_e, aw_bd, ver_bd)
    return wv, e_out


# ----------------------- one-time parameter packing --------------------------
def prepare_params(params):
    """Init-time packing: zero cost in the forward pass."""
    H, D = NUM_HEADS, OUT_DIM
    HD = H * D
    # fused K/V/Q projection (K,V first so the src-gather slice is contiguous)
    w_kvq = jnp.concatenate([params["Wk"], params["Wv"], params["Wq"]], axis=1)
    b_kvq = jnp.concatenate([params["bk"], params["bv"], params["bq"]], axis=1)
    # permute E's output columns from per-head interleaved (h, [E_w|E_b]) into
    # two contiguous halves [all E_w | all E_b], each in (head, dim) order.
    perm = ([h * 2 * D + d for h in range(H) for d in range(D)]
            + [h * 2 * D + D + d for h in range(H) for d in range(D)])
    perm = jnp.asarray(perm, dtype=jnp.int32)
    w_e = params["We"][:, perm]
    b_e = params["be"][:, perm]
    # Aw (D, H) -> block-diagonal (HD, HD), each head's logit column replicated
    # across that head's D output lanes; VeRow (D, H, D) -> block-diagonal (HD, HD).
    aw_bd = jnp.zeros((HD, HD), jnp.float32)
    ver_bd = jnp.zeros((HD, HD), jnp.float32)
    for h in range(H):
        sl = slice(h * D, (h + 1) * D)
        aw_bd = aw_bd.at[sl, sl].set(jnp.tile(params["Aw"][:, h:h + 1], (1, D)))
        ver_bd = ver_bd.at[sl, sl].set(params["VeRow"][:, h, :])
    return dict(Wkvq=w_kvq, bkvq=b_kvq, WeP=w_e, beP=b_e, AwBD=aw_bd, VeRowBD=ver_bd)


# ------------------------------- forward glue --------------------------------
def grit_forward(x, edge_attr, edge_index, prep):
    H, D = NUM_HEADS, OUT_DIM
    ei = edge_index.astype(jnp.int32)
    wv, e_out = grit_attention_fused(
        ei, ei.T, x, edge_attr,
        prep["Wkvq"], prep["bkvq"], prep["WeP"], prep["beP"],
        prep["AwBD"], prep["VeRowBD"],
        num_heads=H, out_dim=D, clamp=CLAMP)
    h_out = wv.reshape(x.shape[0], H, D)   # batch.wV
    return h_out, e_out                    # (batch.wV, batch.wE)


# --------------------- pure-JAX reference (for checking) ---------------------
def reference_forward(x, edge_attr, edge_index, params):
    H, D = NUM_HEADS, OUT_DIM
    n = x.shape[0]
    hp = jax.lax.Precision.HIGHEST
    q = (jnp.dot(x, params["Wq"], precision=hp) + params["bq"]).reshape(n, H, D)
    k = (jnp.dot(x, params["Wk"], precision=hp) + params["bk"]).reshape(n, H, D)
    v = (jnp.dot(x, params["Wv"], precision=hp) + params["bv"]).reshape(n, H, D)
    e = (jnp.dot(edge_attr, params["We"], precision=hp) + params["be"]).reshape(-1, H, 2 * D)
    e_w, e_b = e[..., :D], e[..., D:]
    src, dst = edge_index[0], edge_index[1]
    score = (k[src] + q[dst]) * e_w
    score = jnp.sqrt(jax.nn.relu(score) + 1e-8) - jnp.sqrt(jax.nn.relu(-score) + 1e-8)
    e_t = score + e_b
    wE = e_t.reshape(-1, H * D)
    s = jnp.einsum("ehd,dh->eh", e_t, params["Aw"], precision=hp)[..., None]
    s = jnp.clip(s, -CLAMP, CLAMP)
    s_max = jax.ops.segment_max(s, dst, num_segments=n)
    exp_s = jnp.exp(s - s_max[dst])
    denom = jax.ops.segment_sum(exp_s, dst, num_segments=n)[dst] + 1e-16
    attn = exp_s / denom
    wV = jax.ops.segment_sum(v[src] * attn, dst, num_segments=n)
    rowV = jax.ops.segment_sum(e_t * attn, dst, num_segments=n)
    wV = wV + jnp.einsum("nhd,dhc->nhc", rowV, params["VeRow"], precision=hp)
    return wV, wE


if __name__ == "__main__":
    H, D, HD = NUM_HEADS, OUT_DIM, NUM_HEADS * OUT_DIM
    key = jax.random.PRNGKey(0)
    ks = jax.random.split(key, 13)

    def xavier(k, shape, fan_in, fan_out):
        std = (2.0 / (fan_in + fan_out)) ** 0.5
        return std * jax.random.normal(k, shape, dtype=jnp.float32)

    # inputs
    x = jax.random.normal(ks[0], (N_NODES, IN_DIM), dtype=jnp.float32)
    edge_attr = jax.random.normal(ks[1], (N_EDGES, IN_DIM), dtype=jnp.float32)
    edge_index = jax.random.randint(ks[2], (2, N_EDGES), 0, N_NODES)

    # parameters (Linear weights stored pre-transposed, shape (in, out))
    params = {
        "Wq": xavier(ks[3], (IN_DIM, HD), IN_DIM, HD),
        "Wk": xavier(ks[4], (IN_DIM, HD), IN_DIM, HD),
        "Wv": xavier(ks[5], (IN_DIM, HD), IN_DIM, HD),
        "We": xavier(ks[6], (IN_DIM, 2 * HD), IN_DIM, 2 * HD),
        "bq": 0.01 * jax.random.normal(ks[7], (1, HD), dtype=jnp.float32),
        "bk": 0.01 * jax.random.normal(ks[8], (1, HD), dtype=jnp.float32),
        "bv": 0.01 * jax.random.normal(ks[9], (1, HD), dtype=jnp.float32),
        "be": 0.01 * jax.random.normal(ks[10], (1, 2 * HD), dtype=jnp.float32),
        "Aw": xavier(ks[11], (D, H), H, D),                # Aw (D, H, 1) squeezed
        "VeRow": xavier(ks[12], (D, H, D), H * D, D * D),  # VeRow (D, H, D)
    }

    prep = prepare_params(params)          # one-time packing (init-time)
    fwd = jax.jit(grit_forward)            # single fused pallas_call inside

    h_out, e_out = fwd(x, edge_attr, edge_index, prep)
    jax.block_until_ready((h_out, e_out))

    assert h_out.shape == (N_NODES, H, D)
    assert e_out.shape == (N_EDGES, HD)
    assert bool(jnp.all(jnp.isfinite(h_out))) and bool(jnp.all(jnp.isfinite(e_out)))

    # correctness vs. a pure-JAX reference of the PyTorch module
    h_ref, e_ref = reference_forward(x, edge_attr, edge_index, params)

    def rel_err(a, b):
        return float(jnp.linalg.norm(a - b) / (jnp.linalg.norm(b) + 1e-12))

    assert rel_err(h_out, h_ref) < 3e-2, ("wV mismatch", rel_err(h_out, h_ref))
    assert rel_err(e_out, e_ref) < 3e-2, ("wE mismatch", rel_err(e_out, e_ref))

    print("KERNEL_OK")
</pallas_src>

<mosaic_0001>
module attributes {stable_mosaic.version = 11 : i64} {
  func.func @_grit_fused_kernel(%arg0: i32, %arg1: memref<2x16xi32, #tpu.memory_space<vmem>>, %arg2: memref<16x2xi32, #tpu.memory_space<vmem>>, %arg3: memref<8x32xf32, #tpu.memory_space<vmem>>, %arg4: memref<16x32xf32, #tpu.memory_space<vmem>>, %arg5: memref<32x96xf32, #tpu.memory_space<vmem>>, %arg6: memref<1x96xf32, #tpu.memory_space<vmem>>, %arg7: memref<32x64xf32, #tpu.memory_space<vmem>>, %arg8: memref<1x64xf32, #tpu.memory_space<vmem>>, %arg9: memref<32x32xf32, #tpu.memory_space<vmem>>, %arg10: memref<32x32xf32, #tpu.memory_space<vmem>>, %arg11: memref<8x32xf32, #tpu.memory_space<vmem>>, %arg12: memref<16x32xf32, #tpu.memory_space<vmem>>) attributes {dimension_semantics = [#tpu.dimension_semantics<arbitrary>], iteration_bounds = array<i64: 1>, scalar_prefetch = 0 : i64, scratch_operands = 0 : i64, tpu.core_type = #tpu.core_type<tc>, window_params = [{pipeline_mode = #tpu.pipeline_mode<synchronous>, transform_indices = @transform_0, window_bounds = array<i64: 2, 16>}, {pipeline_mode = #tpu.pipeline_mode<synchronous>, transform_indices = @transform_1, window_bounds = array<i64: 16, 2>}, {pipeline_mode = #tpu.pipeline_mode<synchronous>, transform_indices = @transform_2, window_bounds = array<i64: 8, 32>}, {pipeline_mode = #tpu.pipeline_mode<synchronous>, transform_indices = @transform_3, window_bounds = array<i64: 16, 32>}, {pipeline_mode = #tpu.pipeline_mode<synchronous>, transform_indices = @transform_4, window_bounds = array<i64: 32, 96>}, {pipeline_mode = #tpu.pipeline_mode<synchronous>, transform_indices = @transform_5, window_bounds = array<i64: 1, 96>}, {pipeline_mode = #tpu.pipeline_mode<synchronous>, transform_indices = @transform_6, window_bounds = array<i64: 32, 64>}, {pipeline_mode = #tpu.pipeline_mode<synchronous>, transform_indices = @transform_7, window_bounds = array<i64: 1, 64>}, {pipeline_mode = #tpu.pipeline_mode<synchronous>, transform_indices = @transform_8, window_bounds = array<i64: 32, 32>}, {pipeline_mode = #tpu.pipeline_mode<synchronous>, transform_indices = @transform_9, window_bounds = array<i64: 32, 32>}, {pipeline_mode = #tpu.pipeline_mode<synchronous>, transform_indices = @transform_10, window_bounds = array<i64: 8, 32>}, {pipeline_mode = #tpu.pipeline_mode<synchronous>, transform_indices = @transform_11, window_bounds = array<i64: 16, 32>}]} {
    %c0 = arith.constant 0 : index
    %c0_0 = arith.constant 0 : index
    %0 = vector.load %arg3[%c0, %c0_0] : memref<8x32xf32, #tpu.memory_space<vmem>>, vector<8x32xf32>
    %c0_1 = arith.constant 0 : index
    %c0_2 = arith.constant 0 : index
    %1 = vector.load %arg5[%c0_1, %c0_2] : memref<32x96xf32, #tpu.memory_space<vmem>>, vector<32x96xf32>
    %cst = arith.constant dense<0.000000e+00> : vector<8x96xf32>
    %2 = tpu.matmul %0, %1, %cst {dimension_numbers = #tpu.dot_dimension_numbers<[1], [0], [0], [1], [0, 0, 1, 1], [], []>} : vector<8x32xf32>, vector<32x96xf32>, vector<8x96xf32> -> vector<8x96xf32>
    %c0_3 = arith.constant 0 : index
    %c0_4 = arith.constant 0 : index
    %3 = vector.load %arg6[%c0_3, %c0_4] : memref<1x96xf32, #tpu.memory_space<vmem>>, vector<1x96xf32>
    %4 = vector.broadcast %3 : vector<1x96xf32> to vector<8x96xf32>
    %5 = arith.addf %2, %4 : vector<8x96xf32>
    %c0_5 = arith.constant 0 : index
    %c0_6 = arith.constant 0 : index
    %6 = vector.load %arg4[%c0_5, %c0_6] : memref<16x32xf32, #tpu.memory_space<vmem>>, vector<16x32xf32>
    %c0_7 = arith.constant 0 : index
    %c0_8 = arith.constant 0 : index
    %7 = vector.load %arg7[%c0_7, %c0_8] : memref<32x64xf32, #tpu.memory_space<vmem>>, vector<32x64xf32>
    %cst_9 = arith.constant dense<0.000000e+00> : vector<16x64xf32>
    %8 = tpu.matmul %6, %7, %cst_9 {dimension_numbers = #tpu.dot_dimension_numbers<[1], [0], [0], [1], [0, 0, 1, 1], [], []>} : vector<16x32xf32>, vector<32x64xf32>, vector<16x64xf32> -> vector<16x64xf32>
    %c0_10 = arith.constant 0 : index
    %c0_11 = arith.constant 0 : index
    %9 = vector.load %arg8[%c0_10, %c0_11] : memref<1x64xf32, #tpu.memory_space<vmem>>, vector<1x64xf32>
    %10 = vector.broadcast %9 : vector<1x64xf32> to vector<16x64xf32>
    %11 = arith.addf %8, %10 : vector<16x64xf32>
    %12 = vector.extract_strided_slice %11 {offsets = [0, 0], sizes = [16, 32], strides = [1, 1]} : vector<16x64xf32> to vector<16x32xf32>
    %13 = vector.extract_strided_slice %11 {offsets = [0, 32], sizes = [16, 32], strides = [1, 1]} : vector<16x64xf32> to vector<16x32xf32>
    %14 = tpu.iota {dimensions = array<i32: 1>} : vector<16x8xi32>
    %c0_12 = arith.constant 0 : index
    %c0_13 = arith.constant 0 : index
    %15 = vector.load %arg2[%c0_12, %c0_13] : memref<16x2xi32, #tpu.memory_space<vmem>>, vector<16x1xi32>
    %16 = vector.broadcast %15 : vector<16x1xi32> to vector<16x8xi32>
    %17 = arith.cmpi eq, %14, %16 : vector<16x8xi32>
    %18 = arith.extui %17 : vector<16x8xi1> to vector<16x8xi32>
    %19 = arith.sitofp %18 : vector<16x8xi32> to vector<16x8xf32>
    %c0_14 = arith.constant 0 : index
    %c1 = arith.constant 1 : index
    %20 = vector.load %arg2[%c0_14, %c1] : memref<16x2xi32, #tpu.memory_space<vmem>>, vector<16x1xi32>
    %21 = vector.broadcast %20 : vector<16x1xi32> to vector<16x8xi32>
    %22 = arith.cmpi eq, %14, %21 : vector<16x8xi32>
    %23 = arith.extui %22 : vector<16x8xi1> to vector<16x8xi32>
    %24 = arith.sitofp %23 : vector<16x8xi32> to vector<16x8xf32>
    %25 = tpu.iota {dimensions = array<i32: 0>} : vector<8x16xi32>
    %c1_15 = arith.constant 1 : index
    %c0_16 = arith.constant 0 : index
    %26 = vector.load %arg1[%c1_15, %c0_16] : memref<2x16xi32, #tpu.memory_space<vmem>>, vector<1x16xi32>
    %27 = vector.broadcast %26 : vector<1x16xi32> to vector<8x16xi32>
    %28 = arith.cmpi eq, %25, %27 : vector<8x16xi32>
    %29 = arith.extui %28 : vector<8x16xi1> to vector<8x16xi32>
    %30 = arith.sitofp %29 : vector<8x16xi32> to vector<8x16xf32>
    %31 = vector.extract_strided_slice %5 {offsets = [0, 0], sizes = [8, 64], strides = [1, 1]} : vector<8x96xf32> to vector<8x64xf32>
    %cst_17 = arith.constant dense<0.000000e+00> : vector<16x64xf32>
    %32 = tpu.matmul %19, %31, %cst_17 {dimension_numbers = #tpu.dot_dimension_numbers<[1], [0], [0], [1], [0, 0, 1, 1], [], []>} : vector<16x8xf32>, vector<8x64xf32>, vector<16x64xf32> -> vector<16x64xf32>
    %33 = vector.extract_strided_slice %5 {offsets = [0, 64], sizes = [8, 32], strides = [1, 1]} : vector<8x96xf32> to vector<8x32xf32>
    %cst_18 = arith.constant dense<0.000000e+00> : vector<16x32xf32>
    %34 = tpu.matmul %24, %33, %cst_18 {dimension_numbers = #tpu.dot_dimension_numbers<[1], [0], [0], [1], [0, 0, 1, 1], [], []>} : vector<16x8xf32>, vector<8x32xf32>, vector<16x32xf32> -> vector<16x32xf32>
    %35 = vector.extract_strided_slice %32 {offsets = [0, 0], sizes = [16, 32], strides = [1, 1]} : vector<16x64xf32> to vector<16x32xf32>
    %36 = vector.extract_strided_slice %32 {offsets = [0, 32], sizes = [16, 32], strides = [1, 1]} : vector<16x64xf32> to vector<16x32xf32>
    %37 = arith.addf %35, %34 : vector<16x32xf32>
    %38 = arith.mulf %37, %12 : vector<16x32xf32>
    %cst_19 = arith.constant 9.99999993E-9 : f32
    %cst_20 = arith.constant 5.000000e-01 : f32
    %39 = math.powf %cst_19, %cst_20 : f32
    %40 = math.absf %38 : vector<16x32xf32>
    %cst_21 = arith.constant 9.99999993E-9 : f32
    %41 = vector.broadcast %cst_21 : f32 to vector<16x32xf32>
    %42 = arith.addf %40, %41 : vector<16x32xf32>
    %43 = math.sqrt %42 : vector<16x32xf32>
    %44 = vector.broadcast %39 : f32 to vector<16x32xf32>
    %45 = arith.subf %43, %44 : vector<16x32xf32>
    %cst_22 = arith.constant 0.000000e+00 : f32
    %46 = vector.broadcast %cst_22 : f32 to vector<16x32xf32>
    %47 = arith.cmpf oge, %38, %46 : vector<16x32xf32>
    %cst_23 = arith.constant 0.000000e+00 : f32
    %48 = vector.broadcast %cst_23 : f32 to vector<16x32xf32>
    %49 = arith.subf %48, %45 : vector<16x32xf32>
    %50 = arith.select %47, %45, %49 : vector<16x32xi1>, vector<16x32xf32>
    %51 = arith.addf %50, %13 : vector<16x32xf32>
    %c0_24 = arith.constant 0 : index
    %c0_25 = arith.constant 0 : index
    %52 = vector.load %arg12[%c0_24, %c0_25] : memref<16x32xf32, #tpu.memory_space<vmem>>, vector<16x32xf32>
    tpu.vector_store %arg12[%c0_24, %c0_25], %51 {strides = array<i32>} : memref<16x32xf32, #tpu.memory_space<vmem>>, vector<16x32xf32>,
    %c0_26 = arith.constant 0 : index
    %c0_27 = arith.constant 0 : index
    %53 = vector.load %arg9[%c0_26, %c0_27] : memref<32x32xf32, #tpu.memory_space<vmem>>, vector<32x32xf32>
    %cst_28 = arith.constant dense<0.000000e+00> : vector<16x32xf32>
    %54 = tpu.matmul %51, %53, %cst_28 {dimension_numbers = #tpu.dot_dimension_numbers<[1], [0], [0], [1], [0, 0, 1, 1], [], []>} : vector<16x32xf32>, vector<32x32xf32>, vector<16x32xf32> -> vector<16x32xf32>
    %cst_29 = arith.constant -5.000000e+00 : f32
    %cst_30 = arith.constant 5.000000e+00 : f32
    %55 = vector.broadcast %cst_29 : f32 to vector<16x32xf32>
    %56 = arith.maximumf %55, %54 : vector<16x32xf32>
    %57 = vector.broadcast %cst_30 : f32 to vector<16x32xf32>
    %58 = arith.minimumf %57, %56 : vector<16x32xf32>
    %cst_31 = arith.constant dense<0xFF800000> : vector<32xf32>
    %59 = vector.multi_reduction <maximumf>, %58, %cst_31 [0] : vector<16x32xf32> to vector<32xf32>
    %60 = vector.shape_cast %59 : vector<32xf32> to vector<1x32xf32>
    %61 = vector.broadcast %60 : vector<1x32xf32> to vector<16x32xf32>
    %62 = arith.subf %58, %61 : vector<16x32xf32>
    %63 = math.exp %62 : vector<16x32xf32>
    %cst_32 = arith.constant dense<0.000000e+00> : vector<8x32xf32>
    %64 = tpu.matmul %30, %63, %cst_32 {dimension_numbers = #tpu.dot_dimension_numbers<[1], [0], [0], [1], [0, 0, 1, 1], [], []>} : vector<8x16xf32>, vector<16x32xf32>, vector<8x32xf32> -> vector<8x32xf32>
    %65 = arith.mulf %36, %63 : vector<16x32xf32>
    %cst_33 = arith.constant dense<0.000000e+00> : vector<8x32xf32>
    %66 = tpu.matmul %30, %65, %cst_33 {dimension_numbers = #tpu.dot_dimension_numbers<[1], [0], [0], [1], [0, 0, 1, 1], [], []>} : vector<8x16xf32>, vector<16x32xf32>, vector<8x32xf32> -> vector<8x32xf32>
    %67 = arith.mulf %51, %63 : vector<16x32xf32>
    %cst_34 = arith.constant dense<0.000000e+00> : vector<8x32xf32>
    %68 = tpu.matmul %30, %67, %cst_34 {dimension_numbers = #tpu.dot_dimension_numbers<[1], [0], [0], [1], [0, 0, 1, 1], [], []>} : vector<8x16xf32>, vector<16x32xf32>, vector<8x32xf32> -> vector<8x32xf32>
    %cst_35 = arith.constant 1.000000e-16 : f32
    %69 = vector.broadcast %cst_35 : f32 to vector<8x32xf32>
    %70 = arith.addf %64, %69 : vector<8x32xf32>
    %71 = tpu.reciprocal %70 {approx = true} : vector<8x32xf32> -> vector<8x32xf32>
    %72 = arith.mulf %66, %71 : vector<8x32xf32>
    %73 = arith.mulf %68, %71 : vector<8x32xf32>
    %c0_36 = arith.constant 0 : index
    %c0_37 = arith.constant 0 : index
    %74 = vector.load %arg10[%c0_36, %c0_37] : memref<32x32xf32, #tpu.memory_space<vmem>>, vector<32x32xf32>
    %cst_38 = arith.constant dense<0.000000e+00> : vector<8x32xf32>
    %75 = tpu.matmul %73, %74, %cst_38 {dimension_numbers = #tpu.dot_dimension_numbers<[1], [0], [0], [1], [0, 0, 1, 1], [], []>} : vector<8x32xf32>, vector<32x32xf32>, vector<8x32xf32> -> vector<8x32xf32>
    %76 = arith.addf %72, %75 : vector<8x32xf32>
    %c0_39 = arith.constant 0 : index
    %c0_40 = arith.constant 0 : index
    %77 = vector.load %arg11[%c0_39, %c0_40] : memref<8x32xf32, #tpu.memory_space<vmem>>, vector<8x32xf32>
    tpu.vector_store %arg11[%c0_39, %c0_40], %76 {strides = array<i32>} : memref<8x32xf32, #tpu.memory_space<vmem>>, vector<8x32xf32>,
    return
  }
  func.func @transform_0(%arg0: i32) -> (i32, i32) {
    %c0_i32 = arith.constant 0 : i32
    %c0_i32_0 = arith.constant 0 : i32
    %c0_i32_1 = arith.constant 0 : i32
    return %c0_i32, %c0_i32_0 : i32, i32
  }
  func.func @transform_1(%arg0: i32) -> (i32, i32) {
    %c0_i32 = arith.constant 0 : i32
    %c0_i32_0 = arith.constant 0 : i32
    %c0_i32_1 = arith.constant 0 : i32
    return %c0_i32, %c0_i32_0 : i32, i32
  }
  func.func @transform_2(%arg0: i32) -> (i32, i32) {
    %c0_i32 = arith.constant 0 : i32
    %c0_i32_0 = arith.constant 0 : i32
    %c0_i32_1 = arith.constant 0 : i32
    return %c0_i32, %c0_i32_0 : i32, i32
  }
  func.func @transform_3(%arg0: i32) -> (i32, i32) {
    %c0_i32 = arith.constant 0 : i32
    %c0_i32_0 = arith.constant 0 : i32
    %c0_i32_1 = arith.constant 0 : i32
    return %c0_i32, %c0_i32_0 : i32, i32
  }
  func.func @transform_4(%arg0: i32) -> (i32, i32) {
    %c0_i32 = arith.constant 0 : i32
    %c0_i32_0 = arith.constant 0 : i32
    %c0_i32_1 = arith.constant 0 : i32
    return %c0_i32, %c0_i32_0 : i32, i32
  }
  func.func @transform_5(%arg0: i32) -> (i32, i32) {
    %c0_i32 = arith.constant 0 : i32
    %c0_i32_0 = arith.constant 0 : i32
    %c0_i32_1 = arith.constant 0 : i32
    return %c0_i32, %c0_i32_0 : i32, i32
  }
  func.func @transform_6(%arg0: i32) -> (i32, i32) {
    %c0_i32 = arith.constant 0 : i32
    %c0_i32_0 = arith.constant 0 : i32
    %c0_i32_1 = arith.constant 0 : i32
    return %c0_i32, %c0_i32_0 : i32, i32
  }
  func.func @transform_7(%arg0: i32) -> (i32, i32) {
    %c0_i32 = arith.constant 0 : i32
    %c0_i32_0 = arith.constant 0 : i32
    %c0_i32_1 = arith.constant 0 : i32
    return %c0_i32, %c0_i32_0 : i32, i32
  }
  func.func @transform_8(%arg0: i32) -> (i32, i32) {
    %c0_i32 = arith.constant 0 : i32
    %c0_i32_0 = arith.constant 0 : i32
    %c0_i32_1 = arith.constant 0 : i32
    return %c0_i32, %c0_i32_0 : i32, i32
  }
  func.func @transform_9(%arg0: i32) -> (i32, i32) {
    %c0_i32 = arith.constant 0 : i32
    %c0_i32_0 = arith.constant 0 : i32
    %c0_i32_1 = arith.constant 0 : i32
    return %c0_i32, %c0_i32_0 : i32, i32
  }
  func.func @transform_10(%arg0: i32) -> (i32, i32) {
    %c0_i32 = arith.constant 0 : i32
    %c0_i32_0 = arith.constant 0 : i32
    %c0_i32_1 = arith.constant 0 : i32
    return %c0_i32, %c0_i32_0 : i32, i32
  }
  func.func @transform_11(%arg0: i32) -> (i32, i32) {
    %c0_i32 = arith.constant 0 : i32
    %c0_i32_0 = arith.constant 0 : i32
    %c0_i32_1 = arith.constant 0 : i32
    return %c0_i32, %c0_i32_0 : i32, i32
  }
}

</mosaic_0001>

<bundles_post_ra>
// kernel: grit_forward.1
= control target key start
LH: loop header
LB: loop body
LE: loop exit
PB: predicated region body
PF: predicated region fallthrough
CT: control target
= control target key end

     0   :  { %17 = vsyncpa [#allocation3], 0  ;;  %s1461_s0 = inlined_call_operand.vmem [shape: s32[2,16], index: 0, kind: input, shape index: {}]   ;;  %s1462_s1 = inlined_call_operand.vmem [shape: s32[16,2], index: 1, kind: input, shape index: {}]   ;;  %s1463_s2 = inlined_call_operand.hbm [shape: f32[8,32], index: 2, kind: input, shape index: {}]   ;;  %s1464_s3 = inlined_call_operand.vmem [shape: f32[16,32], index: 3, kind: input, shape index: {}]   ;;  %s1465_s4 = inlined_call_operand.hbm [shape: f32[32,96], index: 4, kind: input, shape index: {}]   ;;  %s1466_s5 = inlined_call_operand.vmem [shape: f32[1,96], index: 5, kind: input, shape index: {}]   ;;  %s1467_s6 = inlined_call_operand.hbm [shape: f32[32,64], index: 6, kind: input, shape index: {}]   ;;  %s1468_s7 = inlined_call_operand.vmem [shape: f32[1,64], index: 7, kind: input, shape index: {}]   ;;  %s1469_s8 = inlined_call_operand.hbm [shape: f32[32,32], index: 8, kind: input, shape index: {}]   ;;  %s1470_s9 = inlined_call_operand.hbm [shape: f32[32,32], index: 9, kind: input, shape index: {}]   ;;  %s1471_s10 = inlined_call_operand.vmem [shape: f32[8,32], index: 10, kind: output, shape index: {0}]   ;;  %s1472_s11 = inlined_call_operand.hbm [shape: f32[16,32], index: 11, kind: output, shape index: {1}]  }
   0x1   :  { %18 = vsyncpa [#allocation6], 0 }
   0x2   :  { %19 = vsyncpa [#allocation9], 0 }
   0x3   :  { %20 = vsyncpa [#allocation4], 0  ;;  %s1268_s17 = smov [#allocation5]  }
   0x4   :  { %s42_s18 = sshll.u32 %s1268_s17, 4  ;;  %s43_s18 = int_to_ptr.vmem [resolvable:$true] %s42_s18 }
   0x5   :  { %s1148_s19 = scalar_lea.vmem %s43_s18, 512  ;;  %p1153_p1 = scmp.lt.s32.totalorder %s43_s18, %s43_s18 }
   0x6   :  { %p1149_p0 = scmp.ne.s32.totalorder %s43_s18, %s1148_s19  ;;  %p1154_p2 = scmp.lt.s32.totalorder %s1148_s19, %s1148_s19 }
   0x8   :  { %p1155_p3 = por %p1154_p2, %p1153_p1 }
   0xa   :  { %p1156_p4 = pnand %p1155_p3, %p1149_p0 }
   0xc   :  { %1159 = shalt.err (!%p1156_p4)
}
   0xd   :  { %s1269_s20 = smov 128   ;;  %s1270_s21 = smov 8  }
   0xe   :  { %48 = dma.hbm_to_vmem [thread:$0]  %s1465_s4, 512, %s43_s18, [#allocation6], %s1269_s20, %s1269_s20, %s1270_s21  }
   0xf   :  { %s1271_s24 = smov [#allocation8]   ;;  %s1272_s26 = smov [#allocation2]  }
  0x10   :  { %s70_s25 = sshll.u32 %s1271_s24, 4  ;;  %s31_s27 = sshll.u32 %s1272_s26, 4  ;;  %s71_s25 = int_to_ptr.vmem [resolvable:$true] %s70_s25  ;;  %s32_s27 = int_to_ptr.vmem [resolvable:$true] %s31_s27 }
  0x11   :  { %s1168_s28 = scalar_lea.vmem %s71_s25, 512  ;;  %p1173_p6 = scmp.lt.s32.totalorder %s71_s25, %s71_s25 }
  0x12   :  { %p1169_p5 = scmp.ne.s32.totalorder %s71_s25, %s1168_s28  ;;  %p1174_p7 = scmp.lt.s32.totalorder %s1168_s28, %s1168_s28 }
  0x14   :  { %p1175_p8 = por %p1174_p7, %p1173_p6 }
  0x16   :  { %p1176_p9 = pnand %p1175_p8, %p1169_p5 }
  0x18   :  { %1179 = shalt.err (!%p1176_p9)
}
  0x19   :  { %76 = dma.hbm_to_vmem [thread:$0]  %s1469_s8, 512, %s71_s25, [#allocation9], %s1269_s20, %s1269_s20, %s1270_s21  }
  0x1a   :  { %s1188_s4 = scalar_lea.vmem %s32_s27, 128  ;;  %p1193_p11 = scmp.lt.s32.totalorder %s32_s27, %s32_s27 }
  0x1b   :  { %p1189_p10 = scmp.ne.s32.totalorder %s32_s27, %s1188_s4  ;;  %p1194_p12 = scmp.lt.s32.totalorder %s1188_s4, %s1188_s4 }
  0x1d   :  { %p1195_p13 = por %p1194_p12, %p1193_p11 }
  0x1f   :  { %p1196_p0 = pnand %p1195_p13, %p1189_p10 }
  0x21   :  { %1199 = shalt.err (!%p1196_p0)
}
  0x22   :  { %34 = dma.hbm_to_vmem [thread:$0]  %s1463_s2, 128, %s32_s27, [#allocation3]  }
  0x23   :  { %s1273_s14 = smov [#allocation7]   ;;  %s1274_s16 = smov [#allocation10]  }
  0x24   :  { %s56_s15 = sshll.u32 %s1273_s14, 4  ;;  %s82_s17 = sshll.u32 %s1274_s16, 4  ;;  %s57_s15 = int_to_ptr.vmem [resolvable:$true] %s56_s15  ;;  %s83_s17 = int_to_ptr.vmem [resolvable:$true] %s82_s17 }
  0x25   :  { %s1208_s18 = scalar_lea.vmem %s57_s15, 512  ;;  %p1213_p2 = scmp.lt.s32.totalorder %s57_s15, %s57_s15 }
  0x26   :  { %p1209_p1 = scmp.ne.s32.totalorder %s57_s15, %s1208_s18  ;;  %p1214_p3 = scmp.lt.s32.totalorder %s1208_s18, %s1208_s18 }
  0x28   :  { %p1215_p4 = por %p1214_p3, %p1213_p2 }
  0x2a   :  { %p1216_p5 = pnand %p1215_p4, %p1209_p1 }
  0x2c   :  { %1219 = shalt.err (!%p1216_p5)
}
  0x2d   :  { %62 = dma.hbm_to_vmem [thread:$0]  %s1467_s6, 512, %s57_s15, [#allocation6], %s1269_s20, %s1269_s20, %s1270_s21  }
  0x2e   :  { %s1228_s2 = scalar_lea.vmem %s83_s17, 512  ;;  %p1233_p7 = scmp.lt.s32.totalorder %s83_s17, %s83_s17 }
  0x2f   :  { %p1229_p6 = scmp.ne.s32.totalorder %s83_s17, %s1228_s2  ;;  %p1234_p8 = scmp.lt.s32.totalorder %s1228_s2, %s1228_s2 }
  0x31   :  { %p1235_p9 = por %p1234_p8, %p1233_p7 }
  0x33   :  { %p1236_p10 = pnand %p1235_p9, %p1229_p6 }
  0x35   :  { %1239 = shalt.err (!%p1236_p10)
}
  0x36   :  { %88 = dma.hbm_to_vmem [thread:$0]  %s1470_s9, 512, %s83_s17, [#allocation9], %s1269_s20, %s1269_s20, %s1270_s21  }
  0x37   :  { %1260 = dma.done.wait [#allocation3], 128  }
  0x38   :  { %1261 = vsyncadd [#allocation3], 4294967168 }
  0x39   :  { %1262 = dma.done.wait [#allocation6], 1024  }
  0x3a   :  { %1263 = vsyncadd [#allocation6], 4294966272 }
  0x3b   :  { %1264 = dma.done.wait [#allocation9], 1024  }
  0x3c   :  { %1265 = vsyncadd [#allocation9], 4294966272  ;;  %v1275_v0 = vmov 0.0   ;;  %vm1276_vm0 = vmmov 0   ;;  %v1277_v1 = vmov 0   ;;  %v108_v2 = vld [vmem:[#allocation5 + $0x18] sm:$0xff]  ;;  %v284_v16 = vlaneseq }
  0x3d   :  { %1036 = vmatprep.subr.mxu0 %v1275_v0  ;;  %1044 = vmatprep.mubr.msk.f32.mxu0 %vm1276_vm0, %v1275_v0  ;;  %v107_v3 = vld [vmem:[#allocation5 + $0x10] sm:$0xff]  ;;  %v286_v4 = vld [vmem:[%s1462_s1] sm:$0xff]  ;;  %v106_v5 = vld [vmem:[#allocation5 + $0x8] sm:$0xff]  ;;  %vm116_vm1 = vcmask 261120   ;;  %v1278_v9 = vmov 1   ;;  %vm322_vm2 = vcmask 64512  }
  0x3e   :  { %1126 = vset.pattern.permute.xlu0 %v1277_v1  ;;  %1128 = vset.pattern.permute.xlu1 %v1277_v1  ;;  %v287_v6 = vld [vmem:[%s1462_s1 + $0x8] sm:$0xff]  ;;  %v104_v8 = vld [vmem:[#allocation2] sm:$0xff]  ;;  %v194_v11 = vld [vmem:[#allocation7 + $0x10] sm:$0xff]  ;;  %v285_v17 = vand.u32 127, %v284_v16  ;;  %s1279_s30 = smov 64   ;;  %s1281_s14 = smov 32  }
  0x3f   :  { %1037 = vmatpush3.msra.mxu0 %v108_v2  ;;  %289 = vperm.xlu0 %1126, %v286_v4   ;;  %v105_v7 = vld [vmem:[#allocation5] sm:$0xff]  ;;  %v195_v10 = vld [vmem:[#allocation7 + $0x18] sm:$0xff]  ;;  %v193_v13 = vld [vmem:[#allocation7 + $0x8] sm:$0xff]  ;;  %vm653_vm14 = vcmask 130048  }
  0x40   :  { %1038 = vmatprep.subr.mxu0 %v1275_v0  ;;  %292 = vperm.xlu1 %1128, %v287_v6   ;;  %v190_v12 = vld [vmem:[%s1464_s3] sm:$0xff]  ;;  %v192_v14 = vld [vmem:[#allocation7] sm:$0xff]  ;;  %v533_v37 = vld [vmem:[#allocation8 + $0x10] sm:$0xff] }
  0x41   :  { %1039 = vmatpush3.msra.mxu0 %v107_v3  ;;  %1047 = vmatprep.subr.mxu1 %v195_v10  ;;  %v191_v15 = vld [vmem:[%s1464_s3 + $0x8] sm:$0xff]  ;;  %v974_v23 = vld [vmem:[%s1466_s5] ss:$0 sm:$0xff]  ;;  %s1280_s5 = smov 96   ;;  %v532_v38 = vld [vmem:[#allocation8 + $0x8] sm:$0xff] }
  0x42   :  { %1040 = vmatprep.subr.mxu0 %v1275_v0  ;;  %1048 = vmatpush3.msra.mxu1 %v195_v10  ;;  %v976_v28 = vld [vmem:[%s1468_s7] ss:$0 sm:$0xff]  ;;  %v531_v39 = vld [vmem:[#allocation8] sm:$0xff] }
  0x43   :  { %1041 = vmatpush3.msra.mxu0 %v106_v5  ;;  %1127 = vset.pattern.permute.xlu0 %v1278_v9  ;;  %v534_v36 = vld [vmem:[#allocation8 + $0x18] sm:$0xff] }
  0x44   :  { %1042 = vmatprep.subr.mxu0 %v1275_v0  ;;  %1129 = vset.pattern.permute.xlu1 %v1278_v9 }
  0x45   :  { %1043 = vmatpush3.msra.mxu0 %v105_v7  ;;  %304 = vperm.xlu1 %1129, %v287_v6  }
  0x46   :  { %1045 = vmatmul.mubr.msk.f32.vlgmr.msra.gmra.mxu0 %vm116_vm1, %v104_v8  ;;  %301 = vperm.xlu0 %1127, %v286_v4  }
  0x47   :  { %1055 = vmatprep.mubr.msk.f32.mxu1 %vm116_vm1, %v190_v12  ;;  %1049 = vmatprep.subr.mxu1 %v194_v11 }
  0x48   :  { %1050 = vmatpush3.msra.mxu1 %v194_v11 }
  0x49   :  { %1051 = vmatprep.subr.mxu1 %v193_v13 }
  0x4a   :  { %1052 = vmatpush3.msra.mxu1 %v193_v13 }
  0x4b   :  { %1053 = vmatprep.subr.mxu1 %v192_v14 }
  0x4c   :  { %1054 = vmatpush3.msra.mxu1 %v192_v14 }
  0x4d   :  { %1056 = vmatmul.mubr.msk.f32.vlgmr.msra.gmra.mxu1 %vm116_vm1, %v191_v15 }
  0xba   :  { %v290_v18 = vpop.permute.xlu0 %289 }
  0xbb   :  { %vm294_vm3 = vcmp.eq.s32.totalorder %v285_v17, %v290_v18  ;;  %v293_v22 = vpop.permute.xlu1 %292 }
  0xbc   :  { %v979_v19 = vsel %vm294_vm3, 1.0, %v1275_v0  ;;  %vm295_vm5 = vcmp.eq.s32.totalorder %v285_v17, %v293_v22 }
  0xbd   :  { %1060 = vmatprep.mubr.msk.f32.mxu0 %vm322_vm2, %v979_v19  ;;  %v980_v27 = vsel %vm295_vm5, 1.0, %v1275_v0 }
  0xc0   :  { %v305_v33 = vpop.permute.xlu1 %304 }
  0xc1   :  { %v302_v20 = vpop.permute.xlu0 %301  ;;  %vm307_vm6 = vcmp.eq.s32.totalorder %v285_v17, %v305_v33 }
  0xc2   :  { %vm306_vm4 = vcmp.eq.s32.totalorder %v285_v17, %v302_v20  ;;  %v982_v35 = vsel %vm307_vm6, 1.0, %v1275_v0 }
  0xc3   :  { %v981_v21 = vsel %vm306_vm4, 1.0, %v1275_v0 }
  0xc4   :  { %1065 = vmatprep.mubr.msk.f32.mxu1 %vm322_vm2, %v981_v21 }
 0x106   :  { %v186_v24 = vpop.f32.mrf.mxu0 }
 0x107   :  { %v187_v25 = vadd.f32 %v974_v23, %v186_v24 }
 0x108   :  { %v1046_v26 = vpop.f32.mrf.mxu0 }
 0x109   :  { %405 = vrot.lane.b32.xlu1 %v187_v25, %s1279_s30  ;;  %1058 = vmatprep.subr.mxu0 %v187_v25 }
 0x10a   :  { %1059 = vmatpush3.msra.mxu0 %v187_v25 }
 0x10b   :  { %1061 = vmatmul.mubr.msk.f32.vlgmr.msra.gmra.mxu0 %vm322_vm2, %v980_v27  ;;  %1068 = vmatprep.subr.mxu0 %v534_v36  ;;  %v313_v27 = vshrl.u32 %v284_v16, 7 }
 0x10c   :  { %1069 = vmatpush3.msra.mxu0 %v534_v36 }
 0x10d   :  { %v1057_v29 = vpop.f32.mrf.mxu1  ;;  %1070 = vmatprep.subr.mxu0 %v533_v37 }
 0x10e   :  { %v281_v30 = vadd.f32 %v1057_v29, %v976_v28  ;;  %1071 = vmatpush3.msra.mxu0 %v533_v37 }
 0x10f   :  { %v275_v31 = vpop.f32.mrf.mxu1  ;;  %1072 = vmatprep.subr.mxu0 %v532_v38 }
 0x110   :  { %v276_v32 = vadd.f32 %v976_v28, %v275_v31  ;;  %523 = vrot.lane.b32.xlu1 %v281_v30, %s1280_s5  ;;  %1073 = vmatpush3.msra.mxu0 %v532_v38  ;;  %v983_v28 = vld [vmem:[%s1461_s0 + $0x1] ss:$0 sm:$0xff]  ;;  %s1282_s0 = smov [#allocation11]  }
 0x111   :  { %1074 = vmatprep.subr.mxu0 %v531_v39  ;;  %vm319_vm13 = vcmp.eq.s32.totalorder %v313_v27, %v983_v28  ;;  %s958_s15 = sshll.u32 %s1282_s0, 4  ;;  %s959_s15 = int_to_ptr.vmem [resolvable:$true] %s958_s15 }
 0x112   :  { %521 = vrot.lane.b32.xlu0 %v276_v32, %s1280_s5  ;;  %1075 = vmatpush3.msra.mxu0 %v531_v39  ;;  %v984_v31 = vsel %vm319_vm13, 1.0, %v1275_v0  ;;  %s1240_s16 = scalar_lea.vmem %s959_s15, 256  ;;  %p1245_p12 = scmp.lt.s32.totalorder %s959_s15, %s959_s15 }
 0x113   :  { %1093 = vmatprep.subr.mxu0 %v1275_v0  ;;  %p1241_p11 = scmp.ne.s32.totalorder %s959_s15, %s1240_s16  ;;  %p1246_p13 = scmp.lt.s32.totalorder %s1240_s16, %s1240_s16 }
 0x115   :  { %p1247_p0 = por %p1246_p13, %p1245_p12 }
 0x117   :  { %p1248_p1 = pnand %p1247_p0, %p1241_p11 }
 0x17b   :  { %v406_v34 = vpop.permute.xlu1 %405 }
 0x17c   :  { %1063 = vmatprep.subr.mxu1 %v406_v34 }
 0x17d   :  { %1064 = vmatpush3.msra.mxu1 %v406_v34 }
 0x17e   :  { %1066 = vmatmul.mubr.msk.f32.vlgmr.msra.gmra.mxu1 %vm322_vm2, %v982_v35  ;;  %1079 = vmatprep.subr.mxu1 %v1275_v0 }
 0x17f   :  { %1083 = vmatprep.mubr.msk.f32.mxu1 %vm1276_vm0, %v1275_v0 }
 0x182   :  { %v524_v63 = vpop.permute.xlu1 %523 }
 0x184   :  { %v522_v6 = vpop.permute.xlu0 %521 }
 0x1cb   :  { %v1412_v40 = vpop.f32.mrf.mxu0 }
 0x1cd   :  { %v1415_v43 = vpop.f32.mrf.mxu0 }
 0x23e   :  { %v1067_v41 = vpop.f32.mrf.mxu1 }
 0x23f   :  { %v490_v42 = vadd.f32 %v1067_v41, %v1412_v40 }
 0x240   :  { %v480_v44 = vpop.f32.mrf.mxu1 }
 0x241   :  { %v492_v45 = vmul.f32 %v490_v42, %v281_v30  ;;  %v489_v46 = vadd.f32 %v480_v44, %v1415_v43  ;;  %v874_v42 = vld [vmem:[#allocation10 + $0x10] sm:$0xff]  ;;  %v872_v44 = vld [vmem:[#allocation10] sm:$0xff] }
 0x243   :  { %v494_v47 = vand.u32 2147483647, %v492_v45  ;;  %v491_v48 = vmul.f32 %v489_v46, %v276_v32  ;;  %vm514_vm11 = vcmp.ge.f32.partialorder %v492_v45, 0.0 }
 0x245   :  { %v496_v49 = vadd.f32 1e-08, %v494_v47  ;;  %v493_v50 = vand.u32 2147483647, %v491_v48  ;;  %vm513_vm12 = vcmp.ge.f32.partialorder %v491_v48, 0.0 }
 0x247   :  { %1130 = vrsqrt.f32 %v496_v49  ;;  %v495_v51 = vadd.f32 1e-08, %v493_v50  ;;  %vm506_vm7 = vcmp.eq.f32.partialorder %v496_v49, inf  ;;  %v509_v55 = vand.u32 2147483648, %v496_v49 }
 0x248   :  { %vm508_vm8 = vcmp.eq.f32.partialorder %v496_v49, 0.0 }
 0x249   :  { %1132 = vrsqrt.f32 %v495_v51  ;;  %vm499_vm9 = vcmp.eq.f32.partialorder %v495_v51, inf  ;;  %v502_v59 = vand.u32 2147483648, %v495_v51  ;;  %vm501_vm10 = vcmp.eq.f32.partialorder %v495_v51, 0.0 }
 0x254   :  { %v1131_v52 = vpop.eup %1130 }
 0x255   :  { %v505_v53 = vmul.f32 %v1131_v52, %v496_v49 }
 0x256   :  { %v1133_v54 = vpop.eup %1132 }
 0x257   :  { %v507_v56 = vsel %vm506_vm7, %v496_v49, %v505_v53  ;;  %v498_v57 = vmul.f32 %v1133_v54, %v495_v51 }
 0x258   :  { %v510_v58 = vsel %vm508_vm8, %v509_v55, %v507_v56 }
 0x259   :  { %v990_v60 = vadd.f32 -0.0001, %v510_v58  ;;  %v500_v61 = vsel %vm499_vm9, %v495_v51, %v498_v57 }
 0x25a   :  { %v503_v62 = vsel %vm501_vm10, %v502_v59, %v500_v61 }
 0x25b   :  { %v516_v1 = vsub.f32 0.0, %v990_v60  ;;  %v989_v2 = vadd.f32 -0.0001, %v503_v62 }
 0x25d   :  { %v518_v3 = vsel %vm514_vm11, %v990_v60, %v516_v1  ;;  %v515_v4 = vsub.f32 0.0, %v989_v2 }
 0x25e   :  { %v528_v5 = vadd.f32 %v524_v63, %v518_v3 }
 0x25f   :  { %v517_v7 = vsel %vm513_vm12, %v989_v2, %v515_v4 }
 0x260   :  { %530 = vst.msk [vmem:[#allocation11 + $0x8] sm:$0xff] %vm116_vm1, %v528_v5  ;;  %v527_v8 = vadd.f32 %v522_v6, %v517_v7 }
 0x262   :  { %529 = vst.msk [vmem:[#allocation11] sm:$0xff] %vm116_vm1, %v527_v8  ;;  %1076 = vmatprep.mubr.msk.f32.mxu0 %vm116_vm1, %v527_v8 }
 0x263   :  { %1077 = vmatmul.mubr.msk.f32.vlgmr.msra.gmra.mxu0 %vm116_vm1, %v528_v5 }
 0x264   :  { %1097 = vmatprep.mubr.msk.f32.mxu0 %vm1276_vm0, %v1275_v0 }
 0x323   :  { %v1078_v9 = vpop.f32.mrf.mxu0 }
 0x324   :  { %v994_v10 = vclamps-f32 %v1078_v9, 5.0 }
 0x325   :  { %v607_v11 = vpop.f32.mrf.mxu0 }
 0x326   :  { %v993_v12 = vclamps-f32 %v607_v11, 5.0  ;;  %v621_v13 = vsel %vm116_vm1, %v994_v10, -inf }
 0x328   :  { %v620_v14 = vsel %vm116_vm1, %v993_v12, -inf }
 0x329   :  { %v622_v15 = vmax.f32 %v620_v14, %v621_v13 }
 0x32b   :  { %v623_v17 = vrot.slane %v622_v15, 4 }
 0x32d   :  { %v624_v18 = vmax.f32 %v622_v15, %v623_v17 }
 0x32f   :  { %v625_v19 = vrot.slane %v624_v18, 2 }
 0x331   :  { %v626_v20 = vmax.f32 %v624_v18, %v625_v19 }
 0x333   :  { %v627_v21 = vrot.slane %v626_v20, 1 }
 0x335   :  { %v628_v22 = vmax.f32 %v626_v20, %v627_v21 }
 0x337   :  { %v629_v23 = vsub.f32 %v993_v12, %v628_v22  ;;  %v630_v24 = vsub.f32 %v994_v10, %v628_v22 }
 0x339   :  { %v631_v25 = vmul.f32 1.442695, %v629_v23  ;;  %v633_v26 = vmul.f32 1.442695, %v630_v24 }
 0x33b   :  { %1134 = vpow2.f32 %v631_v25 }
 0x33c   :  { %1136 = vpow2.f32 %v633_v26 }
 0x348   :  { %v1135_v29 = vpop.eup %1134 }
 0x349   :  { %v1137_v30 = vpop.eup %1136  ;;  %637 = vrot.lane.b32.xlu1 %v1135_v29, %s1281_s14  ;;  %v727_v41 = vmul.f32 %v1135_v29, %v527_v8 }
 0x34a   :  { %639 = vrot.lane.b32.xlu0 %v1137_v30, %s1281_s14  ;;  %1094 = vmatpush3.msra.mxu0 %v1137_v30  ;;  %v728_v39 = vmul.f32 %v1137_v30, %v528_v5 }
 0x34b   :  { %1095 = vmatprep.subr.mxu0 %v1275_v0 }
 0x34c   :  { %1096 = vmatpush3.msra.mxu0 %v1135_v29 }
 0x34d   :  { %1098 = vmatmul.mubr.msk.f32.vlgmr.msra.gmra.mxu0 %vm653_vm14, %v984_v31 }
 0x3bb   :  { %v638_v16 = vpop.permute.xlu1 %637 }
 0x3bc   :  { %v640_v32 = vpop.permute.xlu0 %639  ;;  %v643_v33 = vmul.f32 %v638_v16, %v1415_v43  ;;  %v873_v43 = vld [vmem:[#allocation10 + $0x8] sm:$0xff] }
 0x3bd   :  { %v644_v34 = vmul.f32 %v1412_v40, %v640_v32  ;;  %v875_v40 = vld [vmem:[#allocation10 + $0x18] sm:$0xff] }
 0x3be   :  { %647 = vrot.lane.b32.xlu1 %v643_v33, %s1280_s5 }
 0x3bf   :  { %649 = vrot.lane.b32.xlu0 %v644_v34, %s1280_s5 }
 0x40d   :  { %v865_v35 = vpop.f32.mrf.mxu0 }
 0x40e   :  { %v866_v45 = vadd.f32 1e-16, %v865_v35 }
 0x40f   :  { %v1099_v36 = vpop.f32.mrf.mxu0 }
 0x410   :  { %1138 = vrcp.f32 %v866_v45 }
 0x41d   :  { %v1139_v46 = vpop.eup %1138 }
 0x430   :  { %v648_v38 = vpop.permute.xlu1 %647 }
 0x431   :  { %v650_v37 = vpop.permute.xlu0 %649 }
 0x432   :  { %1080 = vmatpush3.msra.mxu1 %v650_v37 }
 0x433   :  { %1081 = vmatprep.subr.mxu1 %v1275_v0 }
 0x434   :  { %1082 = vmatpush3.msra.mxu1 %v648_v38 }
 0x435   :  { %1084 = vmatmul.mubr.msk.f32.vlgmr.msra.gmra.mxu1 %vm653_vm14, %v984_v31  ;;  %1086 = vmatprep.subr.mxu1 %v1275_v0 }
 0x436   :  { %1087 = vmatpush3.msra.mxu1 %v728_v39  ;;  %1090 = vmatprep.mubr.msk.f32.mxu1 %vm1276_vm0, %v1275_v0 }
 0x437   :  { %1088 = vmatprep.subr.mxu1 %v1275_v0 }
 0x438   :  { %1089 = vmatpush3.msra.mxu1 %v727_v41 }
 0x439   :  { %1091 = vmatmul.mubr.msk.f32.vlgmr.msra.gmra.mxu1 %vm653_vm14, %v984_v31  ;;  %1100 = vmatprep.subr.mxu1 %v1275_v0 }
 0x43a   :  { %1108 = vmatprep.mubr.msk.f32.mxu1 %vm1276_vm0, %v1275_v0  ;;  %1101 = vmatpush3.msra.mxu1 %v875_v40 }
 0x43b   :  { %1102 = vmatprep.subr.mxu1 %v1275_v0 }
 0x43c   :  { %1103 = vmatpush3.msra.mxu1 %v874_v42 }
 0x43d   :  { %1104 = vmatprep.subr.mxu1 %v1275_v0 }
 0x43e   :  { %1105 = vmatpush3.msra.mxu1 %v873_v43 }
 0x43f   :  { %1106 = vmatprep.subr.mxu1 %v1275_v0 }
 0x440   :  { %1107 = vmatpush3.msra.mxu1 %v872_v44 }
 0x4f5   :  { %v723_v47 = vpop.f32.mrf.mxu1 }
 0x4f6   :  { %v870_v48 = vmul.f32 %v1139_v46, %v723_v47 }
 0x4f7   :  { %v1085_v49 = vpop.f32.mrf.mxu1 }
 0x4f9   :  { %v795_v50 = vpop.f32.mrf.mxu1 }
 0x4fa   :  { %v871_v51 = vmul.f32 %v1139_v46, %v795_v50 }
 0x4fb   :  { %v1092_v52 = vpop.f32.mrf.mxu1 }
 0x4fc   :  { %1109 = vmatmul.mubr.msk.f32.vlgmr.msra.gmra.mxu1 %vm116_vm1, %v871_v51 }
 0x4fd   :  { %1251 = shalt.err (!%p1248_p1)
}
 0x4fe   :  { %964 = dma.vmem_to_hbm [thread:$0]  %s959_s15, 256, %s1472_s11, [#allocation4], %s1269_s20, %s1269_s20, %s1270_s21  }
 0x5bc   :  { %v945_v0 = vpop.f32.mrf.mxu1 }
 0x5bd   :  { %v949_v53 = vadd.f32 %v945_v0, %v870_v48 }
 0x5be   :  { %v1110_v54 = vpop.f32.mrf.mxu1 }
 0x5bf   :  { %950 = vst.msk [vmem:[%s1471_s10] sm:$0xff] %vm116_vm1, %v949_v53 }
 0x5c0   :  { %1266 = dma.done.wait [#allocation4], 256  }
 0x5c1   :  { %1267 = vsyncadd [#allocation4], 4294967040 }
 0x5c2   :  { %970 = vsyncpa [#allocation3], 1 }
 0x5c3   :  { %971 = vsyncpa [#allocation6], 1 }
 0x5c4   :  { %972 = vsyncpa [#allocation9], 1 }
 0x5c5   :  { %973 = vsyncpa [#allocation4], 1 }

</bundles_post_ra>
